<compile_context>
chip_gen: v7x
topology: tpu7x:2x2x1
jax: 0.10.0
libtpu: 0.0.40
codegen_flags: <defaults>
</compile_context>

<pallas_src>
import functools

import jax
import jax.numpy as jnp
from jax import lax
from jax.experimental import pallas as pl
from jax.experimental.pallas import tpu as pltpu

TEMPERATURE = 10.0
BASE_TEMPERATURE = 100.0


def _round_up(x, m):
    return ((x + m - 1) // m) * m


def _accumulate(adc, pos_mask, keep_mask, col_valid, o_ref,
                m_acc, z_acc, p_acc, c_acc, *, temperature, base_temperature):
    """Online per-row reduction over one (T, T) tile of the similarity matrix."""
    j = pl.program_id(1)

    @pl.when(j == 0)
    def _():
        m_acc[...] = jnp.full_like(m_acc, -jnp.inf)
        z_acc[...] = jnp.zeros_like(z_acc)
        p_acc[...] = jnp.zeros_like(p_acc)
        c_acc[...] = jnp.zeros_like(c_acc)

    # Row max over *valid* columns only (diagonal included, like the module).
    adc_v = jnp.where(col_valid, adc, -jnp.inf)
    m_new = jnp.maximum(m_acc[...], jnp.max(adc_v, axis=1, keepdims=True))

    # Online rescale of the running exp-sum (note the module's 1.05 factor).
    alpha = jnp.exp(1.05 * (m_acc[...] - m_new))
    e = jnp.exp(1.05 * (adc_v - m_new)) * keep_mask
    z_acc[...] = alpha * z_acc[...] + jnp.sum(e, axis=1, keepdims=True)

    # Max-independent accumulators (no rescaling needed).
    p_acc[...] = p_acc[...] + jnp.sum(pos_mask * adc, axis=1, keepdims=True)
    c_acc[...] = c_acc[...] + jnp.sum(pos_mask, axis=1, keepdims=True)
    m_acc[...] = m_new

    @pl.when(j == pl.num_programs(1) - 1)
    def _():
        c = c_acc[...]
        # sum_j mask*log_prob = P - C*m - C*log(Z)
        mean_log_prob_pos = (
            p_acc[...] - c * m_acc[...] - c * jnp.log(z_acc[...])) / (c + 1.0)
        o_ref[...] = (-(temperature / base_temperature)
                      * mean_log_prob_pos).astype(o_ref.dtype)


def _tile_similarity(frow_ref, fcol_ref, *, temperature):
    # Fold 1/T into the small (T, D) row tile; contract dim 1 with dim 1 so the
    # MXU is fed the transposed-RHS form directly (no explicit .T / relayout).
    frow = frow_ref[...].astype(jnp.float32) * jnp.float32(1.0 / temperature)
    fcol = fcol_ref[...].astype(jnp.float32)
    return lax.dot_general(frow, fcol,
                           dimension_numbers=(((1,), (1,)), ((), ())),
                           preferred_element_type=jnp.float32)


def _tile_index_masks(shape, batch_size, tile):
    i = pl.program_id(0)
    j = pl.program_id(1)
    row_ids = i * tile + lax.broadcasted_iota(jnp.int32, shape, 0)
    col_ids = j * tile + lax.broadcasted_iota(jnp.int32, shape, 1)
    col_valid = col_ids < batch_size
    keep = jnp.logical_and(col_valid, row_ids != col_ids)   # per-tile logits_mask
    return col_valid, keep


def _supcon_labels_kernel(rowlab_ref, collab_ref, frow_ref, fcol_ref, o_ref,
                          m_acc, z_acc, p_acc, c_acc, *,
                          temperature, base_temperature, batch_size, tile):
    adc = _tile_similarity(frow_ref, fcol_ref, temperature=temperature)
    col_valid, keep = _tile_index_masks(adc.shape, batch_size, tile)
    same = rowlab_ref[...] == collab_ref[...]          # (T,1)==(1,T) -> (T,T)
    pos = jnp.logical_and(same, keep).astype(jnp.float32)
    _accumulate(adc, pos, keep.astype(jnp.float32), col_valid, o_ref,
                m_acc, z_acc, p_acc, c_acc,
                temperature=temperature, base_temperature=base_temperature)


def _supcon_mask_kernel(mask_ref, frow_ref, fcol_ref, o_ref,
                        m_acc, z_acc, p_acc, c_acc, *,
                        temperature, base_temperature, batch_size, tile):
    adc = _tile_similarity(frow_ref, fcol_ref, temperature=temperature)
    col_valid, keep = _tile_index_masks(adc.shape, batch_size, tile)
    keep_f = keep.astype(jnp.float32)
    pos = mask_ref[...].astype(jnp.float32) * keep_f
    _accumulate(adc, pos, keep_f, col_valid, o_ref,
                m_acc, z_acc, p_acc, c_acc,
                temperature=temperature, base_temperature=base_temperature)


def supcon_loss(features, labels=None, mask=None,
                temperature=TEMPERATURE, base_temperature=BASE_TEMPERATURE):
    # TODO(synk): contrast_mode='one' (degenerate for the 2-D features path of
    # the original module) is not implemented; this is the 'all' forward.
    features = jnp.asarray(features, jnp.float32)
    batch_size, feat_dim = features.shape
    if labels is not None and mask is not None:
        raise ValueError("Cannot define both `labels` and `mask`")

    # Square tiles over the (B, B) similarity matrix, sized for v7x's smaller
    # VMEM: per grid step the live set is two (T, D_pad) feature tiles, one
    # (T, T) f32 similarity tile and O(T) accumulators.
    tile = 256 if batch_size > 256 else _round_up(batch_size, 8)
    b_pad = _round_up(batch_size, tile)
    d_pad = _round_up(feat_dim, 128)          # lane-dense feature loads

    f_pad = jnp.zeros((b_pad, d_pad), jnp.float32)
    f_pad = f_pad.at[:batch_size, :feat_dim].set(features)

    grid = (b_pad // tile, b_pad // tile)
    feat_row_spec = pl.BlockSpec((tile, d_pad), lambda i, j: (i, 0))
    feat_col_spec = pl.BlockSpec((tile, d_pad), lambda i, j: (j, 0))
    out_spec = pl.BlockSpec((tile, 1), lambda i, j: (i, 0))
    out_shape = jax.ShapeDtypeStruct((b_pad, 1), jnp.float32)
    scratch = [pltpu.VMEM((tile, 1), jnp.float32) for _ in range(4)]
    cparams = pltpu.CompilerParams(
        dimension_semantics=("parallel", "arbitrary"))   # rows -> both TCs on v7x
    static = dict(temperature=float(temperature),
                  base_temperature=float(base_temperature),
                  batch_size=batch_size, tile=tile)

    if mask is None:
        if labels is None:
            labels = jnp.arange(batch_size, dtype=jnp.int32)   # identity mask
        else:
            labels = jnp.asarray(labels).reshape(-1).astype(jnp.int32)
            if labels.shape[0] != batch_size:
                raise ValueError("Num of labels does not match num of features")
        lab = jnp.full((b_pad,), -1, jnp.int32).at[:batch_size].set(labels)
        per_anchor = pl.pallas_call(
            functools.partial(_supcon_labels_kernel, **static),
            out_shape=out_shape,
            grid_spec=pltpu.PrefetchScalarGridSpec(
                num_scalar_prefetch=0, grid=grid,
                in_specs=[pl.BlockSpec((tile, 1), lambda i, j: (i, 0)),
                          pl.BlockSpec((1, tile), lambda i, j: (0, j)),
                          feat_row_spec, feat_col_spec],
                out_specs=out_spec,
                scratch_shapes=scratch),
            compiler_params=cparams,
        )(lab.reshape(b_pad, 1), lab.reshape(1, b_pad), f_pad, f_pad)
    else:
        mask_pad = jnp.zeros((b_pad, b_pad), jnp.float32)
        mask_pad = mask_pad.at[:batch_size, :batch_size].set(
            jnp.asarray(mask, jnp.float32))
        per_anchor = pl.pallas_call(
            functools.partial(_supcon_mask_kernel, **static),
            out_shape=out_shape,
            grid_spec=pltpu.PrefetchScalarGridSpec(
                num_scalar_prefetch=0, grid=grid,
                in_specs=[pl.BlockSpec((tile, tile), lambda i, j: (i, j)),
                          feat_row_spec, feat_col_spec],
                out_specs=out_spec,
                scratch_shapes=scratch),
            compiler_params=cparams,
        )(mask_pad, f_pad, f_pad)

    # Padded rows produce exactly 0 and are excluded here anyway.
    return jnp.mean(per_anchor[:batch_size, 0])


def _supcon_loss_ref(features, labels=None, mask=None,
                     temperature=TEMPERATURE, base_temperature=BASE_TEMPERATURE):
    """Pure-JAX reference mirroring the PyTorch forward (contrast_mode='all')."""
    b = features.shape[0]
    if mask is None:
        if labels is None:
            mask = jnp.eye(b, dtype=jnp.float32)
        else:
            labels = labels.reshape(-1, 1)
            mask = (labels == labels.T).astype(jnp.float32)
    else:
        mask = mask.astype(jnp.float32)
    adc = jnp.matmul(features, features.T,
                     precision=lax.Precision.HIGHEST) / temperature
    logits = adc - jnp.max(adc, axis=1, keepdims=True)
    adc_den = adc * 1.05
    logits_den = adc_den - jnp.max(adc_den, axis=1, keepdims=True)
    logits_mask = 1.0 - jnp.eye(b, dtype=jnp.float32)
    mask = mask * logits_mask
    exp_logits = jnp.exp(logits_den) * logits_mask
    log_prob = logits - jnp.log(exp_logits.sum(1, keepdims=True))
    mlpp = (mask * log_prob).sum(1) / (mask.sum(1) + 1.0)
    return jnp.mean(-(temperature / base_temperature) * mlpp)


if __name__ == "__main__":
    key = jax.random.PRNGKey(0)
    k1, k2, k3, k4 = jax.random.split(key, 4)

    # 1) labels path, small demo shape (batch=8, hidden=32).
    b, d = 8, 32
    feats = jax.random.normal(k1, (b, d), dtype=jnp.float32)
    labels = jax.random.randint(k2, (b,), 0, 4, dtype=jnp.int32)
    out = jax.block_until_ready(supcon_loss(feats, labels=labels))
    ref = _supcon_loss_ref(feats, labels=labels)
    assert jnp.allclose(out, ref, rtol=1e-5, atol=1e-5), (out, ref)

    # 2) labels path, non-aligned batch/feature dims -> exercises padding and
    #    the multi-tile online reduction (tile=256, b_pad=512, grid 2x2).
    b2, d2 = 300, 96
    feats2 = jax.random.normal(k3, (b2, d2), dtype=jnp.float32) * 0.5
    labels2 = jax.random.randint(k4, (b2,), 0, 10, dtype=jnp.int32)
    out2 = jax.block_until_ready(supcon_loss(feats2, labels=labels2))
    ref2 = _supcon_loss_ref(feats2, labels=labels2)
    assert jnp.allclose(out2, ref2, rtol=1e-4, atol=1e-4), (out2, ref2)

    # 3) explicit mask path.
    mask3 = (jax.random.uniform(k2, (b, b)) > 0.5).astype(jnp.float32)
    out3 = jax.block_until_ready(supcon_loss(feats, mask=mask3))
    ref3 = _supcon_loss_ref(feats, mask=mask3)
    assert jnp.allclose(out3, ref3, rtol=1e-5, atol=1e-5), (out3, ref3)

    print("KERNEL_OK")
</pallas_src>

<mosaic_0001>
module attributes {stable_mosaic.version = 11 : i64} {
  func.func @_supcon_labels_kernel(%arg0: i32, %arg1: i32, %arg2: memref<8x1xi32, #tpu.memory_space<vmem>>, %arg3: memref<1x8xi32, #tpu.memory_space<vmem>>, %arg4: memref<8x128xf32, #tpu.memory_space<vmem>>, %arg5: memref<8x128xf32, #tpu.memory_space<vmem>>, %arg6: memref<8x1xf32, #tpu.memory_space<vmem>>, %arg7: memref<8x1xf32, #tpu.memory_space<vmem>>, %arg8: memref<8x1xf32, #tpu.memory_space<vmem>>, %arg9: memref<8x1xf32, #tpu.memory_space<vmem>>, %arg10: memref<8x1xf32, #tpu.memory_space<vmem>>) attributes {dimension_semantics = [#tpu.dimension_semantics<parallel>, #tpu.dimension_semantics<arbitrary>], iteration_bounds = array<i64: 1, 1>, scalar_prefetch = 0 : i64, scratch_operands = 4 : i64, tpu.core_type = #tpu.core_type<tc>, window_params = [{transform_indices = @transform_0, window_bounds = array<i64: 8, 1>}, {transform_indices = @transform_1, window_bounds = array<i64: 1, 8>}, {transform_indices = @transform_2, window_bounds = array<i64: 8, 128>}, {transform_indices = @transform_3, window_bounds = array<i64: 8, 128>}, {transform_indices = @transform_4, window_bounds = array<i64: 8, 1>}]} {
    %c0 = arith.constant 0 : index
    %c0_0 = arith.constant 0 : index
    %0 = vector.load %arg4[%c0, %c0_0] : memref<8x128xf32, #tpu.memory_space<vmem>>, vector<8x128xf32>
    %cst = arith.constant 1.000000e-01 : f32
    %1 = vector.broadcast %cst : f32 to vector<8x128xf32>
    %2 = arith.mulf %0, %1 : vector<8x128xf32>
    %c0_1 = arith.constant 0 : index
    %c0_2 = arith.constant 0 : index
    %3 = vector.load %arg5[%c0_1, %c0_2] : memref<8x128xf32, #tpu.memory_space<vmem>>, vector<8x128xf32>
    %cst_3 = arith.constant dense<0.000000e+00> : vector<8x8xf32>
    %4 = tpu.matmul %2, %3, %cst_3 {dimension_numbers = #tpu.dot_dimension_numbers<[1], [1], [0], [0], [0, 0, 1, 0], [], []>} : vector<8x128xf32>, vector<8x128xf32>, vector<8x8xf32> -> vector<8x8xf32>
    %c8_i32 = arith.constant 8 : i32
    %5 = arith.muli %arg0, %c8_i32 : i32
    %6 = tpu.iota {dimensions = array<i32: 0>} : vector<8x8xi32>
    %7 = vector.broadcast %5 : i32 to vector<8x8xi32>
    %8 = arith.addi %7, %6 : vector<8x8xi32>
    %c8_i32_4 = arith.constant 8 : i32
    %9 = arith.muli %arg1, %c8_i32_4 : i32
    %10 = tpu.iota {dimensions = array<i32: 1>} : vector<8x8xi32>
    %11 = vector.broadcast %9 : i32 to vector<8x8xi32>
    %12 = arith.addi %11, %10 : vector<8x8xi32>
    %c8_i32_5 = arith.constant 8 : i32
    %13 = vector.broadcast %c8_i32_5 : i32 to vector<8x8xi32>
    %14 = arith.cmpi slt, %12, %13 : vector<8x8xi32>
    %15 = arith.cmpi ne, %8, %12 : vector<8x8xi32>
    %16 = arith.andi %14, %15 : vector<8x8xi1>
    %c0_6 = arith.constant 0 : index
    %c0_7 = arith.constant 0 : index
    %17 = vector.load %arg2[%c0_6, %c0_7] : memref<8x1xi32, #tpu.memory_space<vmem>>, vector<8x1xi32>
    %c0_8 = arith.constant 0 : index
    %c0_9 = arith.constant 0 : index
    %18 = vector.load %arg3[%c0_8, %c0_9] : memref<1x8xi32, #tpu.memory_space<vmem>>, vector<1x8xi32>
    %19 = vector.broadcast %17 : vector<8x1xi32> to vector<8x8xi32>
    %20 = vector.broadcast %18 : vector<1x8xi32> to vector<8x8xi32>
    %21 = arith.cmpi eq, %19, %20 : vector<8x8xi32>
    %22 = arith.andi %21, %16 : vector<8x8xi1>
    %23 = arith.extui %22 : vector<8x8xi1> to vector<8x8xi32>
    %24 = arith.sitofp %23 : vector<8x8xi32> to vector<8x8xf32>
    %25 = arith.extui %16 : vector<8x8xi1> to vector<8x8xi32>
    %26 = arith.sitofp %25 : vector<8x8xi32> to vector<8x8xf32>
    %c0_i32 = arith.constant 0 : i32
    %27 = arith.cmpi eq, %arg1, %c0_i32 : i32
    %28 = arith.extui %27 : i1 to i32
    %c0_i32_10 = arith.constant 0 : i32
    %29 = arith.cmpi ne, %28, %c0_i32_10 : i32
    scf.if %29 {
      %cst_38 = arith.constant 0xFF800000 : f32
      %68 = vector.broadcast %cst_38 : f32 to vector<8x1xf32>
      %c0_39 = arith.constant 0 : index
      %c0_40 = arith.constant 0 : index
      %69 = vector.load %arg7[%c0_39, %c0_40] : memref<8x1xf32, #tpu.memory_space<vmem>>, vector<8x1xf32>
      tpu.vector_store %arg7[%c0_39, %c0_40], %68 {strides = array<i32>} : memref<8x1xf32, #tpu.memory_space<vmem>>, vector<8x1xf32>,
      %cst_41 = arith.constant 0.000000e+00 : f32
      %70 = vector.broadcast %cst_41 : f32 to vector<8x1xf32>
      %c0_42 = arith.constant 0 : index
      %c0_43 = arith.constant 0 : index
      %71 = vector.load %arg8[%c0_42, %c0_43] : memref<8x1xf32, #tpu.memory_space<vmem>>, vector<8x1xf32>
      tpu.vector_store %arg8[%c0_42, %c0_43], %70 {strides = array<i32>} : memref<8x1xf32, #tpu.memory_space<vmem>>, vector<8x1xf32>,
      %cst_44 = arith.constant 0.000000e+00 : f32
      %72 = vector.broadcast %cst_44 : f32 to vector<8x1xf32>
      %c0_45 = arith.constant 0 : index
      %c0_46 = arith.constant 0 : index
      %73 = vector.load %arg9[%c0_45, %c0_46] : memref<8x1xf32, #tpu.memory_space<vmem>>, vector<8x1xf32>
      tpu.vector_store %arg9[%c0_45, %c0_46], %72 {strides = array<i32>} : memref<8x1xf32, #tpu.memory_space<vmem>>, vector<8x1xf32>,
      %cst_47 = arith.constant 0.000000e+00 : f32
      %74 = vector.broadcast %cst_47 : f32 to vector<8x1xf32>
      %c0_48 = arith.constant 0 : index
      %c0_49 = arith.constant 0 : index
      %75 = vector.load %arg10[%c0_48, %c0_49] : memref<8x1xf32, #tpu.memory_space<vmem>>, vector<8x1xf32>
      tpu.vector_store %arg10[%c0_48, %c0_49], %74 {strides = array<i32>} : memref<8x1xf32, #tpu.memory_space<vmem>>, vector<8x1xf32>,
    } else {
    }
    %cst_11 = arith.constant 0xFF800000 : f32
    %30 = vector.broadcast %cst_11 : f32 to vector<8x8xf32>
    %31 = arith.select %14, %4, %30 : vector<8x8xi1>, vector<8x8xf32>
    %c0_12 = arith.constant 0 : index
    %c0_13 = arith.constant 0 : index
    %32 = vector.load %arg7[%c0_12, %c0_13] : memref<8x1xf32, #tpu.memory_space<vmem>>, vector<8x1xf32>
    %cst_14 = arith.constant dense<0xFF800000> : vector<8xf32>
    %33 = vector.multi_reduction <maximumf>, %31, %cst_14 [1] : vector<8x8xf32> to vector<8xf32>
    %34 = vector.shape_cast %33 : vector<8xf32> to vector<8x1xf32>
    %35 = arith.maximumf %32, %34 : vector<8x1xf32>
    %c0_15 = arith.constant 0 : index
    %c0_16 = arith.constant 0 : index
    %36 = vector.load %arg7[%c0_15, %c0_16] : memref<8x1xf32, #tpu.memory_space<vmem>>, vector<8x1xf32>
    %37 = arith.subf %36, %35 : vector<8x1xf32>
    %cst_17 = arith.constant 1.050000e+00 : f32
    %38 = vector.broadcast %cst_17 : f32 to vector<8x1xf32>
    %39 = arith.mulf %38, %37 : vector<8x1xf32>
    %40 = math.exp %39 : vector<8x1xf32>
    %41 = vector.broadcast %35 : vector<8x1xf32> to vector<8x8xf32>
    %42 = arith.subf %31, %41 : vector<8x8xf32>
    %cst_18 = arith.constant 1.050000e+00 : f32
    %43 = vector.broadcast %cst_18 : f32 to vector<8x8xf32>
    %44 = arith.mulf %43, %42 : vector<8x8xf32>
    %45 = math.exp %44 : vector<8x8xf32>
    %46 = arith.mulf %45, %26 : vector<8x8xf32>
    %c0_19 = arith.constant 0 : index
    %c0_20 = arith.constant 0 : index
    %47 = vector.load %arg8[%c0_19, %c0_20] : memref<8x1xf32, #tpu.memory_space<vmem>>, vector<8x1xf32>
    %48 = arith.mulf %40, %47 : vector<8x1xf32>
    %cst_21 = arith.constant dense<0.000000e+00> : vector<8xf32>
    %49 = vector.multi_reduction <add>, %46, %cst_21 [1] : vector<8x8xf32> to vector<8xf32>
    %50 = vector.shape_cast %49 : vector<8xf32> to vector<8x1xf32>
    %51 = arith.addf %48, %50 : vector<8x1xf32>
    %c0_22 = arith.constant 0 : index
    %c0_23 = arith.constant 0 : index
    %52 = vector.load %arg8[%c0_22, %c0_23] : memref<8x1xf32, #tpu.memory_space<vmem>>, vector<8x1xf32>
    tpu.vector_store %arg8[%c0_22, %c0_23], %51 {strides = array<i32>} : memref<8x1xf32, #tpu.memory_space<vmem>>, vector<8x1xf32>,
    %c0_24 = arith.constant 0 : index
    %c0_25 = arith.constant 0 : index
    %53 = vector.load %arg9[%c0_24, %c0_25] : memref<8x1xf32, #tpu.memory_space<vmem>>, vector<8x1xf32>
    %54 = arith.mulf %24, %4 : vector<8x8xf32>
    %cst_26 = arith.constant dense<0.000000e+00> : vector<8xf32>
    %55 = vector.multi_reduction <add>, %54, %cst_26 [1] : vector<8x8xf32> to vector<8xf32>
    %56 = vector.shape_cast %55 : vector<8xf32> to vector<8x1xf32>
    %57 = arith.addf %53, %56 : vector<8x1xf32>
    %c0_27 = arith.constant 0 : index
    %c0_28 = arith.constant 0 : index
    %58 = vector.load %arg9[%c0_27, %c0_28] : memref<8x1xf32, #tpu.memory_space<vmem>>, vector<8x1xf32>
    tpu.vector_store %arg9[%c0_27, %c0_28], %57 {strides = array<i32>} : memref<8x1xf32, #tpu.memory_space<vmem>>, vector<8x1xf32>,
    %c0_29 = arith.constant 0 : index
    %c0_30 = arith.constant 0 : index
    %59 = vector.load %arg10[%c0_29, %c0_30] : memref<8x1xf32, #tpu.memory_space<vmem>>, vector<8x1xf32>
    %cst_31 = arith.constant dense<0.000000e+00> : vector<8xf32>
    %60 = vector.multi_reduction <add>, %24, %cst_31 [1] : vector<8x8xf32> to vector<8xf32>
    %61 = vector.shape_cast %60 : vector<8xf32> to vector<8x1xf32>
    %62 = arith.addf %59, %61 : vector<8x1xf32>
    %c0_32 = arith.constant 0 : index
    %c0_33 = arith.constant 0 : index
    %63 = vector.load %arg10[%c0_32, %c0_33] : memref<8x1xf32, #tpu.memory_space<vmem>>, vector<8x1xf32>
    tpu.vector_store %arg10[%c0_32, %c0_33], %62 {strides = array<i32>} : memref<8x1xf32, #tpu.memory_space<vmem>>, vector<8x1xf32>,
    %c0_34 = arith.constant 0 : index
    %c0_35 = arith.constant 0 : index
    %64 = vector.load %arg7[%c0_34, %c0_35] : memref<8x1xf32, #tpu.memory_space<vmem>>, vector<8x1xf32>
    tpu.vector_store %arg7[%c0_34, %c0_35], %35 {strides = array<i32>} : memref<8x1xf32, #tpu.memory_space<vmem>>, vector<8x1xf32>,
    %c0_i32_36 = arith.constant 0 : i32
    %65 = arith.cmpi eq, %arg1, %c0_i32_36 : i32
    %66 = arith.extui %65 : i1 to i32
    %c0_i32_37 = arith.constant 0 : i32
    %67 = arith.cmpi ne, %66, %c0_i32_37 : i32
    scf.if %67 {
      %c0_38 = arith.constant 0 : index
      %c0_39 = arith.constant 0 : index
      %68 = vector.load %arg10[%c0_38, %c0_39] : memref<8x1xf32, #tpu.memory_space<vmem>>, vector<8x1xf32>
      %c0_40 = arith.constant 0 : index
      %c0_41 = arith.constant 0 : index
      %69 = vector.load %arg9[%c0_40, %c0_41] : memref<8x1xf32, #tpu.memory_space<vmem>>, vector<8x1xf32>
      %c0_42 = arith.constant 0 : index
      %c0_43 = arith.constant 0 : index
      %70 = vector.load %arg7[%c0_42, %c0_43] : memref<8x1xf32, #tpu.memory_space<vmem>>, vector<8x1xf32>
      %71 = arith.mulf %68, %70 : vector<8x1xf32>
      %72 = arith.subf %69, %71 : vector<8x1xf32>
      %c0_44 = arith.constant 0 : index
      %c0_45 = arith.constant 0 : index
      %73 = vector.load %arg8[%c0_44, %c0_45] : memref<8x1xf32, #tpu.memory_space<vmem>>, vector<8x1xf32>
      %74 = math.log %73 : vector<8x1xf32>
      %75 = arith.mulf %68, %74 : vector<8x1xf32>
      %76 = arith.subf %72, %75 : vector<8x1xf32>
      %cst_46 = arith.constant 1.000000e+00 : f32
      %77 = vector.broadcast %cst_46 : f32 to vector<8x1xf32>
      %78 = arith.addf %68, %77 : vector<8x1xf32>
      %79 = arith.divf %76, %78 : vector<8x1xf32>
      %cst_47 = arith.constant -1.000000e-01 : f32
      %80 = vector.broadcast %cst_47 : f32 to vector<8x1xf32>
      %81 = arith.mulf %80, %79 : vector<8x1xf32>
      %c0_48 = arith.constant 0 : index
      %c0_49 = arith.constant 0 : index
      %82 = vector.load %arg6[%c0_48, %c0_49] : memref<8x1xf32, #tpu.memory_space<vmem>>, vector<8x1xf32>
      tpu.vector_store %arg6[%c0_48, %c0_49], %81 {strides = array<i32>} : memref<8x1xf32, #tpu.memory_space<vmem>>, vector<8x1xf32>,
    } else {
    }
    return
  }
  func.func @transform_0(%arg0: i32, %arg1: i32) -> (i32, i32) {
    %c0_i32 = arith.constant 0 : i32
    %c0_i32_0 = arith.constant 0 : i32
    return %arg0, %c0_i32 : i32, i32
  }
  func.func @transform_1(%arg0: i32, %arg1: i32) -> (i32, i32) {
    %c0_i32 = arith.constant 0 : i32
    %c0_i32_0 = arith.constant 0 : i32
    return %c0_i32, %arg1 : i32, i32
  }
  func.func @transform_2(%arg0: i32, %arg1: i32) -> (i32, i32) {
    %c0_i32 = arith.constant 0 : i32
    %c0_i32_0 = arith.constant 0 : i32
    return %arg0, %c0_i32 : i32, i32
  }
  func.func @transform_3(%arg0: i32, %arg1: i32) -> (i32, i32) {
    %c0_i32 = arith.constant 0 : i32
    %c0_i32_0 = arith.constant 0 : i32
    return %arg1, %c0_i32 : i32, i32
  }
  func.func @transform_4(%arg0: i32, %arg1: i32) -> (i32, i32) {
    %c0_i32 = arith.constant 0 : i32
    %c0_i32_0 = arith.constant 0 : i32
    return %arg0, %c0_i32 : i32, i32
  }
}

</mosaic_0001>

<bundles_post_ra>
// kernel: tpu_custom_call.1
= control target key start
LH: loop header
LB: loop body
LE: loop exit
PB: predicated region body
PF: predicated region fallthrough
CT: control target
= control target key end

     0   :  { %9 = vsyncpa [#allocation7], 0  ;;  %s254_s15 = smov [#allocation6]   ;;  %s330_s0 = inlined_call_operand.vmem [shape: s32[8,1], index: 0, kind: input, shape index: {}]   ;;  %s331_s1 = inlined_call_operand.hbm [shape: s32[1,8], index: 1, kind: input, shape index: {}]   ;;  %s332_s2 = inlined_call_operand.vmem [shape: f32[8,128], index: 2, kind: input, shape index: {}]   ;;  %s333_s3 = inlined_call_operand.vmem [shape: f32[8,128], index: 3, kind: input, shape index: {}]   ;;  %s334_s4 = inlined_call_operand.vmem [shape: f32[8,1], index: 4, kind: output, shape index: {}]  }
   0x1   :  { %s18_s16 = sshll.u32 %s254_s15, 4  ;;  %s230_s19 = scalar_lea.hbm %s331_s1, 16  ;;  %s19_s16 = int_to_ptr.vmem [resolvable:$true] %s18_s16 }
   0x2   :  { %p231_p0 = scmp.ne.s32.totalorder %s331_s1, %s230_s19  ;;  %p234_p1 = scmp.lt.u32.totalorder %s230_s19, %s331_s1 }
   0x4   :  { %p236_p2 = pnand %p234_p1, %p231_p0 }
   0x6   :  { %239 = shalt.err (!%p236_p2)
}
   0x7   :  { %s240_s24 = scalar_lea.vmem %s19_s16, 16  ;;  %s244_s25 = scalar_lea.vmem %s19_s16, 32 }
   0x8   :  { %p241_p3 = scmp.ne.s32.totalorder %s19_s16, %s240_s24  ;;  %p245_p4 = scmp.lt.s32.totalorder %s19_s16, %s19_s16 }
   0x9   :  { %p246_p5 = scmp.lt.s32.totalorder %s244_s25, %s240_s24 }
   0xb   :  { %p247_p6 = por %p246_p5, %p245_p4 }
   0xd   :  { %p248_p7 = pnand %p247_p6, %p241_p3 }
   0xf   :  { %251 = shalt.err (!%p248_p7)
}
  0x10   :  { %21 = dma.hbm_to_vmem [thread:$0]  %s331_s1, 16, %s19_s16, [#allocation7]  }
  0x11   :  { %252 = dma.done.wait [#allocation7], 16  }
  0x12   :  { %253 = vsyncadd [#allocation7], 4294967280  ;;  %v103_v0 = vlaneseq  ;;  %v255_v1 = vmov 0.0   ;;  %vm256_vm0 = vmmov 0   ;;  %v257_v2 = vmov 0   ;;  %v31_v5 = vld [vmem:[%s333_s3] sm:$0xff] }
  0x13   :  { %210 = vmatprep.subr.mxu0 %v255_v1  ;;  %212 = vmatprep.mubr.msk.f32.mxu0 %vm256_vm0, %v255_v1  ;;  %v29_v6 = vld [vmem:[%s332_s2] sm:$0xff]  ;;  %vm134_vm2 = vcmask 7168   ;;  %v258_v9 = vmov -inf   ;;  %v205_v10 = vld [vmem:[#allocation6] ss:$0 sm:$0xff]  ;;  %vm141_vm7 = vcmask 64512  }
  0x14   :  { %221 = vset.pattern.permute.xlu1 %v257_v2  ;;  %v104_v3 = vshrl.u32 %v103_v0, 7  ;;  %v109_v4 = vand.u32 127, %v103_v0  ;;  %220 = vset.pattern.permute.xlu0 %v257_v2  ;;  %v115_v7 = vld [vmem:[%s330_s0] sm:$0xff]  ;;  %v30_v8 = vmul.f32 0.1, %v29_v6  ;;  %135 = vst.msk [vmem:[#allocation2] sm:$0xff] %vm134_vm2, %v258_v9 }
  0x15   :  { %211 = vmatpush3.xpose.msra.mxu0 %v31_v5  ;;  %118 = vperm.xlu1 %221, %v115_v7   ;;  %136 = vst.msk [vmem:[#allocation3] sm:$0xff] %vm134_vm2, %v255_v1  ;;  %137 = vst.msk [vmem:[#allocation4] sm:$0xff] %vm134_vm2, %v255_v1 }
  0x16   :  { %vm113_vm1 = vcmp.ne.s32.totalorder %v104_v3, %v109_v4  ;;  %138 = vst.msk [vmem:[#allocation5] sm:$0xff] %vm134_vm2, %v255_v1  ;;  %vm112_vm3 = vcmp.lt.s32.totalorder %v109_v4, 8 }
  0x17   :  { %vm310_vm4 = vmand %vm112_vm3, %vm113_vm1 }
  0x18   :  { %213 = vmatmul.mubr.f32.vlgmr.msra.gmra.mrb[0].mxu0 %v30_v8  ;;  %v207_v27 = vsel %vm310_vm4, 1.0, %v255_v1 }
  0x1b   :  { %v140_v19 = vld [vmem:[#allocation2] sm:$0xff] }
  0x1c   :  { %v160_v36 = vld [vmem:[#allocation3] sm:$0xff]  ;;  %v168_v43 = vld [vmem:[#allocation4] sm:$0xff] }
  0x1d   :  { %v175_v40 = vld [vmem:[#allocation5] sm:$0xff] }
  0x94   :  { %v119_v11 = vpop.permute.xlu1 %118 }
  0x95   :  { %vm124_vm5 = vcmp.eq.s32.totalorder %v119_v11, %v205_v10 }
  0x96   :  { %vm125_vm6 = vmand %vm124_vm5, %vm310_vm4 }
  0x97   :  { %v206_v13 = vsel %vm125_vm6, 1.0, %v255_v1 }
  0x98   :  { %v176_v31 = vsel %vm141_vm7, %v206_v13, 0.0 }
  0xeb   :  { %v98_v14 = vpop.f32.mrb[0].mxu0 }
  0xec   :  { %v214_v15 = vpop.f32.mrb[1].mxu0  ;;  %v139_v16 = vsel %vm112_vm3, %v98_v14, -inf  ;;  %v169_v17 = vmul.f32 %v206_v13, %v98_v14 }
  0xed   :  { %v142_v18 = vsel %vm141_vm7, %v139_v16, -inf }
  0xee   :  { %143 = vmax.xlane.f32.xlu0 %v142_v18  ;;  %v170_v32 = vsel %vm141_vm7, %v169_v17, 0.0 }
 0x17b   :  { %v144_v20 = vpop.xlane.xlu0 %143 }
 0x17c   :  { %v145_v21 = vmax.f32 %v140_v19, %v144_v20 }
 0x17e   :  { %v146_v22 = vsub.f32 %v140_v19, %v145_v21  ;;  %181 = vst.msk [vmem:[#allocation2] sm:$0xff] %vm134_vm2, %v145_v21  ;;  %152 = vperm.xlu0 %220, %v145_v21  }
 0x180   :  { %v147_v33 = vmul.f32 1.05, %v146_v22 }
 0x182   :  { %v148_v34 = vmul.f32 1.442695, %v147_v33 }
 0x185   :  { %v187_v50 = vld [vmem:[#allocation2] sm:$0xff] }
 0x1fd   :  { %v153_v23 = vpop.permute.xlu0 %152 }
 0x1fe   :  { %v155_v24 = vsub.f32 %v139_v16, %v153_v23 }
 0x200   :  { %v156_v25 = vmul.f32 1.05, %v155_v24 }
 0x202   :  { %v157_v26 = vmul.f32 1.442695, %v156_v25 }
 0x204   :  { %222 = vpow2.f32 %v157_v26 }
 0x205   :  { %224 = vpow2.f32 %v148_v34 }
 0x20e   :  { %v223_v28 = vpop.eup %222 }
 0x20f   :  { %v159_v29 = vmul.f32 %v223_v28, %v207_v27  ;;  %v225_v35 = vpop.eup %224 }
 0x210   :  { %v161_v37 = vmul.f32 %v225_v35, %v160_v36 }
 0x211   :  { %v162_v30 = vsel %vm141_vm7, %v159_v29, 0.0 }
 0x212   :  { %163 = vadd.xlane.f32.xlu1 %v162_v30 }
 0x216   :  { %177 = vadd.xlane.f32.xlu1 %v176_v31 }
 0x21a   :  { %171 = vadd.xlane.f32.xlu1 %v170_v32 }
 0x29f   :  { %v164_v38 = vpop.xlane.xlu1 %163 }
 0x2a0   :  { %v165_v39 = vadd.f32 %v164_v38, %v161_v37 }
 0x2a2   :  { %167 = vst.msk [vmem:[#allocation3] sm:$0xff] %vm134_vm2, %v165_v39 }
 0x2a3   :  { %v178_v41 = vpop.xlane.xlu1 %177 }
 0x2a4   :  { %v179_v42 = vadd.f32 %v178_v41, %v175_v40 }
 0x2a6   :  { %180 = vst.msk [vmem:[#allocation5] sm:$0xff] %vm134_vm2, %v179_v42 }
 0x2a7   :  { %v172_v44 = vpop.xlane.xlu1 %171 }
 0x2a8   :  { %v173_v45 = vadd.f32 %v172_v44, %v168_v43 }
 0x2a9   :  { %v190_v46 = vld [vmem:[#allocation3] sm:$0xff] }
 0x2aa   :  { %226 = vlog2.f32 %v190_v46  ;;  %174 = vst.msk [vmem:[#allocation4] sm:$0xff] %vm134_vm2, %v173_v45 }
 0x2ad   :  { %v185_v47 = vld [vmem:[#allocation5] sm:$0xff] }
 0x2ae   :  { %v195_v48 = vadd.f32 1.0, %v185_v47  ;;  %v188_v52 = vmul.f32 %v187_v50, %v185_v47 }
 0x2b0   :  { %228 = vrcp.f32 %v195_v48 }
 0x2b1   :  { %v186_v51 = vld [vmem:[#allocation4] sm:$0xff] }
 0x2b2   :  { %v189_v55 = vsub.f32 %v186_v51, %v188_v52 }
 0x2b4   :  { %v227_v49 = vpop.eup %226 }
 0x2b5   :  { %v192_v53 = vmul.f32 0.6931472, %v227_v49 }
 0x2b7   :  { %v193_v54 = vmul.f32 %v192_v53, %v185_v47 }
 0x2b9   :  { %v194_v56 = vsub.f32 %v189_v55, %v193_v54 }
 0x2ba   :  { %v229_v57 = vpop.eup %228 }
 0x2bb   :  { %v197_v58 = vmul.f32 %v229_v57, %v194_v56 }
 0x2bd   :  { %v198_v59 = vmul.f32 -0.1, %v197_v58 }
 0x2bf   :  { %199 = vst.msk [vmem:[%s334_s4] sm:$0xff] %vm134_vm2, %v198_v59 }
 0x2c0   :  { %204 = vsyncpa [#allocation7], 1 }

</bundles_post_ra>
